<compile_context>
chip_gen: v7x
topology: tpu7x:2x2x1
jax: 0.10.0
libtpu: 0.0.40
codegen_flags: <defaults>
</compile_context>

<pallas_src>
import functools

import jax
import jax.numpy as jnp
from jax.experimental import pallas as pl
from jax.experimental.pallas import tpu as pltpu


# -----------------------------------------------------------------------------
# Kernel: the whole PENN forward for one (TB, *) batch tile.
#   layer A : [z | omega] -> 256 lanes   (block-diag w1a ⊕ w2a, split-K dots)
#   layer B : 256 -> 256                 (block-diag w1b ⊕ w2b)
#   layer C : 256 -> 128                 (f1 -> lanes 0:100 [ReLU],
#                                         f2 -> lanes 100:103 [no ReLU])
#   f3      : 128 -> 128 -> 128 -> 128 (valid col 0)
# -----------------------------------------------------------------------------
def penn_kernel(z_ref, om_ref,
                wAz, wAom, bA,          # fused layer A
                wB, bB,                 # fused layer B
                wC, bC,                 # fused layer C (produces "combined")
                w3a, b3a, w3b, b3b, w3c, b3c, w3d, b3d,   # f3 head
                out_ref):
    def mm(x, w_ref):
        w = w_ref[...]
        # bf16 x bf16 on the MXU with f32 accumulation.
        return jnp.dot(x.astype(w.dtype), w, preferred_element_type=jnp.float32)

    relu = lambda x: jnp.maximum(x, 0.0)

    # Fused layer A: two split-K dots (K=27 and K=13) write disjoint lane
    # ranges of the same 256-wide hidden; no input lane-padding needed.
    hA = relu(mm(z_ref[...], wAz) + mm(om_ref[...], wAom) + bA[...])

    # Fused layer B (block-diagonal 256x256).
    hB = relu(mm(hA, wB) + bB[...])

    # Fused layer C -> "combined" (128 lanes).  f1 part (lanes < 100) gets the
    # ReLU, the f2 embedding (lanes 100:103) does not; lanes 103:128 are 0.
    hC = mm(hB, wC) + bC[...]
    lane = jax.lax.broadcasted_iota(jnp.int32, hC.shape, 1)
    combined = jnp.where(lane < 100, relu(hC), hC)

    # f3 head.
    h = relu(mm(combined, w3a) + b3a[...])
    h = relu(mm(h, w3b) + b3b[...])
    h = relu(mm(h, w3c) + b3c[...])
    y = mm(h, w3d) + b3d[...]          # (TB, 128), valid column 0
    out_ref[...] = y[:, 0:1]


# -----------------------------------------------------------------------------
# Deterministic PyTorch-shaped parameter init
# -----------------------------------------------------------------------------
def _linear_params(key, in_dim, out_dim):
    kw, kb = jax.random.split(key)
    bound = 1.0 / jnp.sqrt(in_dim)
    w = jax.random.uniform(kw, (out_dim, in_dim), jnp.float32, -bound, bound)
    b = jax.random.uniform(kb, (out_dim,), jnp.float32, -bound, bound)
    return w, b


def init_penn_params(key):
    dims_f1 = [(27, 100), (100, 100), (100, 100)]
    dims_f2 = [(13, 30), (30, 30), (30, 3)]
    dims_f3 = [(103, 100), (100, 100), (100, 100), (100, 1)]
    keys = jax.random.split(key, len(dims_f1) + len(dims_f2) + len(dims_f3))
    it = iter(keys)
    f1 = [_linear_params(next(it), i, o) for i, o in dims_f1]
    f2 = [_linear_params(next(it), i, o) for i, o in dims_f2]
    f3 = [_linear_params(next(it), i, o) for i, o in dims_f3]
    return f1, f2, f3


# -----------------------------------------------------------------------------
# Pack the torch-layout params into the fused / padded kernel layout.
# Weights -> bf16 (MXU native), biases stay f32 (added after f32 accumulate).
# -----------------------------------------------------------------------------
def pack_params(f1, f2, f3, weight_dtype=jnp.bfloat16):
    (w1a, b1a), (w1b, b1b), (w1c, b1c) = f1
    (w2a, b2a), (w2b, b2b), (w2c, b2c) = f2
    (w3a, b3a), (w3b, b3b), (w3c, b3c), (w3d, b3d) = f3

    def zeros(*s):
        return jnp.zeros(s, jnp.float32)

    # Layer A, split K: z-part (27,256) and omega-part (13,256).
    wAz = zeros(27, 256).at[:, :100].set(w1a.T)
    wAom = zeros(13, 256).at[:, 128:158].set(w2a.T)
    bA = zeros(1, 256).at[0, :100].set(b1a).at[0, 128:158].set(b2a)

    # Layer B, block-diagonal (256,256).
    wB = zeros(256, 256).at[:100, :100].set(w1b.T).at[128:158, 128:158].set(w2b.T)
    bB = zeros(1, 256).at[0, :100].set(b1b).at[0, 128:158].set(b2b)

    # Layer C, (256,128): f1 -> cols 0:100, f2 embedding -> cols 100:103.
    wC = zeros(256, 128).at[:100, :100].set(w1c.T).at[128:158, 100:103].set(w2c.T)
    bC = zeros(1, 128).at[0, :100].set(b1c).at[0, 100:103].set(b2c)

    # f3 layers, all 128x128 (combined layout: rows 0:100 = f1, 100:103 = f2).
    def pad_sq(w, b, in_valid, out_valid):
        wp = zeros(128, 128).at[:in_valid, :out_valid].set(w.T)
        bp = zeros(1, 128).at[0, :out_valid].set(b)
        return wp, bp

    w3a_p, b3a_p = pad_sq(w3a, b3a, 103, 100)
    w3b_p, b3b_p = pad_sq(w3b, b3b, 100, 100)
    w3c_p, b3c_p = pad_sq(w3c, b3c, 100, 100)
    w3d_p, b3d_p = pad_sq(w3d, b3d, 100, 1)

    cast = lambda w: w.astype(weight_dtype)
    return (cast(wAz), cast(wAom), bA,
            cast(wB), bB,
            cast(wC), bC,
            cast(w3a_p), b3a_p, cast(w3b_p), b3b_p,
            cast(w3c_p), b3c_p, cast(w3d_p), b3d_p)


# -----------------------------------------------------------------------------
# Wrapper: batch-tiled pallas_call with VMEM-resident weights.
# -----------------------------------------------------------------------------
def _round_up(x, m):
    return (x + m - 1) // m * m


@functools.partial(jax.jit, static_argnames=("block_b",))
def penn_forward(z, omega, params, *, block_b=512):
    assert block_b % 8 == 0
    B = z.shape[0]
    TB = min(block_b, _round_up(B, 8))          # batch tile (multiple of 8)
    Bp = _round_up(B, TB)
    if Bp != B:                                  # only pad ragged batches
        z = jnp.pad(z, ((0, Bp - B), (0, 0)))
        omega = jnp.pad(omega, ((0, Bp - B), (0, 0)))

    def row_spec(cols):
        return pl.BlockSpec((TB, cols), lambda i: (i, 0))

    def resident_spec(shape):
        return pl.BlockSpec(shape, lambda i: (0, 0))   # stays in VMEM

    in_specs = [row_spec(z.shape[1]), row_spec(omega.shape[1])]
    in_specs += [resident_spec(p.shape) for p in params]

    out = pl.pallas_call(
        penn_kernel,
        out_shape=jax.ShapeDtypeStruct((Bp, 1), jnp.float32),
        grid=(Bp // TB,),
        in_specs=in_specs,
        out_specs=row_spec(1),
        compiler_params=pltpu.CompilerParams(
            dimension_semantics=("parallel",)),
    )(z, omega, *params)
    return out[:B]


# -----------------------------------------------------------------------------
# References.  mxu_dtype=bfloat16 mimics the kernel's precision exactly
# (bf16 operands, f32 accumulate); mxu_dtype=float32 is the original module.
# -----------------------------------------------------------------------------
def penn_reference(z, omega, f1, f2, f3, mxu_dtype=jnp.float32):
    def lin(x, w, b):
        return jnp.dot(x.astype(mxu_dtype), w.T.astype(mxu_dtype),
                       preferred_element_type=jnp.float32) + b

    relu = lambda x: jnp.maximum(x, 0.0)
    h = relu(lin(z, *f1[0]))
    h = relu(lin(h, *f1[1]))
    f1o = relu(lin(h, *f1[2]))
    g = relu(lin(omega, *f2[0]))
    g = relu(lin(g, *f2[1]))
    f2o = lin(g, *f2[2])
    c = jnp.concatenate([f1o, f2o], axis=1)
    c = relu(lin(c, *f3[0]))
    c = relu(lin(c, *f3[1]))
    c = relu(lin(c, *f3[2]))
    return lin(c, *f3[3])


if __name__ == "__main__":
    key = jax.random.PRNGKey(0)
    k_params, k_z, k_om = jax.random.split(key, 3)

    B = 8
    z = jax.random.normal(k_z, (B, 27), jnp.float32)
    omega = jax.random.normal(k_om, (B, 13), jnp.float32)

    f1, f2, f3 = init_penn_params(k_params)
    params = pack_params(f1, f2, f3)

    out = penn_forward(z, omega, params)
    out = jax.block_until_ready(out)
    assert out.shape == (B, 1)

    # Exact-precision check (kernel math: bf16 operands, f32 accumulate).
    ref_bf16 = penn_reference(z, omega, f1, f2, f3, mxu_dtype=jnp.bfloat16)
    err_bf16 = float(jnp.max(jnp.abs(out - ref_bf16)))
    assert jnp.allclose(out, ref_bf16, atol=1e-3, rtol=1e-3), (
        f"bf16-precision reference mismatch: max abs err {err_bf16}")

    # Sanity check against the original full-f32 module semantics.
    ref_f32 = penn_reference(z, omega, f1, f2, f3, mxu_dtype=jnp.float32)
    err_f32 = float(jnp.max(jnp.abs(out - ref_f32)))
    assert jnp.allclose(out, ref_f32, atol=5e-2, rtol=5e-2), (
        f"f32 reference mismatch: max abs err {err_f32}")

    print("KERNEL_OK")
</pallas_src>

<mosaic_0001>
module attributes {stable_mosaic.version = 11 : i64} {
  func.func @penn_kernel(%arg0: i32, %arg1: memref<8x27xf32, #tpu.memory_space<vmem>>, %arg2: memref<8x13xf32, #tpu.memory_space<vmem>>, %arg3: memref<27x256xbf16, #tpu.memory_space<vmem>>, %arg4: memref<13x256xbf16, #tpu.memory_space<vmem>>, %arg5: memref<1x256xf32, #tpu.memory_space<vmem>>, %arg6: memref<256x256xbf16, #tpu.memory_space<vmem>>, %arg7: memref<1x256xf32, #tpu.memory_space<vmem>>, %arg8: memref<256x128xbf16, #tpu.memory_space<vmem>>, %arg9: memref<1x128xf32, #tpu.memory_space<vmem>>, %arg10: memref<128x128xbf16, #tpu.memory_space<vmem>>, %arg11: memref<1x128xf32, #tpu.memory_space<vmem>>, %arg12: memref<128x128xbf16, #tpu.memory_space<vmem>>, %arg13: memref<1x128xf32, #tpu.memory_space<vmem>>, %arg14: memref<128x128xbf16, #tpu.memory_space<vmem>>, %arg15: memref<1x128xf32, #tpu.memory_space<vmem>>, %arg16: memref<128x128xbf16, #tpu.memory_space<vmem>>, %arg17: memref<1x128xf32, #tpu.memory_space<vmem>>, %arg18: memref<8x1xf32, #tpu.memory_space<vmem>>) attributes {dimension_semantics = [#tpu.dimension_semantics<parallel>], iteration_bounds = array<i64: 1>, scalar_prefetch = 0 : i64, scratch_operands = 0 : i64, tpu.core_type = #tpu.core_type<tc>, window_params = [{transform_indices = @transform_0, window_bounds = array<i64: 8, 27>}, {transform_indices = @transform_1, window_bounds = array<i64: 8, 13>}, {pipeline_mode = #tpu.pipeline_mode<synchronous>, transform_indices = @transform_2, window_bounds = array<i64: 27, 256>}, {pipeline_mode = #tpu.pipeline_mode<synchronous>, transform_indices = @transform_3, window_bounds = array<i64: 13, 256>}, {pipeline_mode = #tpu.pipeline_mode<synchronous>, transform_indices = @transform_4, window_bounds = array<i64: 1, 256>}, {pipeline_mode = #tpu.pipeline_mode<synchronous>, transform_indices = @transform_5, window_bounds = array<i64: 256, 256>}, {pipeline_mode = #tpu.pipeline_mode<synchronous>, transform_indices = @transform_6, window_bounds = array<i64: 1, 256>}, {pipeline_mode = #tpu.pipeline_mode<synchronous>, transform_indices = @transform_7, window_bounds = array<i64: 256, 128>}, {pipeline_mode = #tpu.pipeline_mode<synchronous>, transform_indices = @transform_8, window_bounds = array<i64: 1, 128>}, {pipeline_mode = #tpu.pipeline_mode<synchronous>, transform_indices = @transform_9, window_bounds = array<i64: 128, 128>}, {pipeline_mode = #tpu.pipeline_mode<synchronous>, transform_indices = @transform_10, window_bounds = array<i64: 1, 128>}, {pipeline_mode = #tpu.pipeline_mode<synchronous>, transform_indices = @transform_11, window_bounds = array<i64: 128, 128>}, {pipeline_mode = #tpu.pipeline_mode<synchronous>, transform_indices = @transform_12, window_bounds = array<i64: 1, 128>}, {pipeline_mode = #tpu.pipeline_mode<synchronous>, transform_indices = @transform_13, window_bounds = array<i64: 128, 128>}, {pipeline_mode = #tpu.pipeline_mode<synchronous>, transform_indices = @transform_14, window_bounds = array<i64: 1, 128>}, {pipeline_mode = #tpu.pipeline_mode<synchronous>, transform_indices = @transform_15, window_bounds = array<i64: 128, 128>}, {pipeline_mode = #tpu.pipeline_mode<synchronous>, transform_indices = @transform_16, window_bounds = array<i64: 1, 128>}, {transform_indices = @transform_17, window_bounds = array<i64: 8, 1>}]} {
    %c0 = arith.constant 0 : index
    %c0_0 = arith.constant 0 : index
    %0 = vector.load %arg1[%c0, %c0_0] : memref<8x27xf32, #tpu.memory_space<vmem>>, vector<8x27xf32>
    %c0_1 = arith.constant 0 : index
    %c0_2 = arith.constant 0 : index
    %1 = vector.load %arg3[%c0_1, %c0_2] : memref<27x256xbf16, #tpu.memory_space<vmem>>, vector<27x256xbf16>
    %2 = arith.truncf %0 : vector<8x27xf32> to vector<8x27xbf16>
    %cst = arith.constant dense<0.000000e+00> : vector<8x256xf32>
    %3 = tpu.matmul %2, %1, %cst {dimension_numbers = #tpu.dot_dimension_numbers<[1], [0], [0], [1], [0, 0, 1, 1], [], []>} : vector<8x27xbf16>, vector<27x256xbf16>, vector<8x256xf32> -> vector<8x256xf32>
    %c0_3 = arith.constant 0 : index
    %c0_4 = arith.constant 0 : index
    %4 = vector.load %arg2[%c0_3, %c0_4] : memref<8x13xf32, #tpu.memory_space<vmem>>, vector<8x13xf32>
    %c0_5 = arith.constant 0 : index
    %c0_6 = arith.constant 0 : index
    %5 = vector.load %arg4[%c0_5, %c0_6] : memref<13x256xbf16, #tpu.memory_space<vmem>>, vector<13x256xbf16>
    %6 = arith.truncf %4 : vector<8x13xf32> to vector<8x13xbf16>
    %cst_7 = arith.constant dense<0.000000e+00> : vector<8x256xf32>
    %7 = tpu.matmul %6, %5, %cst_7 {dimension_numbers = #tpu.dot_dimension_numbers<[1], [0], [0], [1], [0, 0, 1, 1], [], []>} : vector<8x13xbf16>, vector<13x256xbf16>, vector<8x256xf32> -> vector<8x256xf32>
    %8 = arith.addf %3, %7 : vector<8x256xf32>
    %c0_8 = arith.constant 0 : index
    %c0_9 = arith.constant 0 : index
    %9 = vector.load %arg5[%c0_8, %c0_9] : memref<1x256xf32, #tpu.memory_space<vmem>>, vector<1x256xf32>
    %10 = vector.broadcast %9 : vector<1x256xf32> to vector<8x256xf32>
    %11 = arith.addf %8, %10 : vector<8x256xf32>
    %cst_10 = arith.constant 0.000000e+00 : f32
    %12 = vector.broadcast %cst_10 : f32 to vector<8x256xf32>
    %13 = arith.maximumf %11, %12 : vector<8x256xf32>
    %c0_11 = arith.constant 0 : index
    %c0_12 = arith.constant 0 : index
    %14 = vector.load %arg6[%c0_11, %c0_12] : memref<256x256xbf16, #tpu.memory_space<vmem>>, vector<256x256xbf16>
    %15 = arith.truncf %13 : vector<8x256xf32> to vector<8x256xbf16>
    %cst_13 = arith.constant dense<0.000000e+00> : vector<8x256xf32>
    %16 = tpu.matmul %15, %14, %cst_13 {dimension_numbers = #tpu.dot_dimension_numbers<[1], [0], [0], [1], [0, 0, 1, 1], [], []>} : vector<8x256xbf16>, vector<256x256xbf16>, vector<8x256xf32> -> vector<8x256xf32>
    %c0_14 = arith.constant 0 : index
    %c0_15 = arith.constant 0 : index
    %17 = vector.load %arg7[%c0_14, %c0_15] : memref<1x256xf32, #tpu.memory_space<vmem>>, vector<1x256xf32>
    %18 = vector.broadcast %17 : vector<1x256xf32> to vector<8x256xf32>
    %19 = arith.addf %16, %18 : vector<8x256xf32>
    %cst_16 = arith.constant 0.000000e+00 : f32
    %20 = vector.broadcast %cst_16 : f32 to vector<8x256xf32>
    %21 = arith.maximumf %19, %20 : vector<8x256xf32>
    %c0_17 = arith.constant 0 : index
    %c0_18 = arith.constant 0 : index
    %22 = vector.load %arg8[%c0_17, %c0_18] : memref<256x128xbf16, #tpu.memory_space<vmem>>, vector<256x128xbf16>
    %23 = arith.truncf %21 : vector<8x256xf32> to vector<8x256xbf16>
    %cst_19 = arith.constant dense<0.000000e+00> : vector<8x128xf32>
    %24 = tpu.matmul %23, %22, %cst_19 {dimension_numbers = #tpu.dot_dimension_numbers<[1], [0], [0], [1], [0, 0, 1, 1], [], []>} : vector<8x256xbf16>, vector<256x128xbf16>, vector<8x128xf32> -> vector<8x128xf32>
    %c0_20 = arith.constant 0 : index
    %c0_21 = arith.constant 0 : index
    %25 = vector.load %arg9[%c0_20, %c0_21] : memref<1x128xf32, #tpu.memory_space<vmem>>, vector<1x128xf32>
    %26 = vector.broadcast %25 : vector<1x128xf32> to vector<8x128xf32>
    %27 = arith.addf %24, %26 : vector<8x128xf32>
    %28 = tpu.iota {dimensions = array<i32: 1>} : vector<8x128xi32>
    %c100_i32 = arith.constant 100 : i32
    %29 = vector.broadcast %c100_i32 : i32 to vector<8x128xi32>
    %30 = arith.cmpi slt, %28, %29 : vector<8x128xi32>
    %cst_22 = arith.constant 0.000000e+00 : f32
    %31 = vector.broadcast %cst_22 : f32 to vector<8x128xf32>
    %32 = arith.maximumf %27, %31 : vector<8x128xf32>
    %33 = arith.select %30, %32, %27 : vector<8x128xi1>, vector<8x128xf32>
    %c0_23 = arith.constant 0 : index
    %c0_24 = arith.constant 0 : index
    %34 = vector.load %arg10[%c0_23, %c0_24] : memref<128x128xbf16, #tpu.memory_space<vmem>>, vector<128x128xbf16>
    %35 = arith.truncf %33 : vector<8x128xf32> to vector<8x128xbf16>
    %cst_25 = arith.constant dense<0.000000e+00> : vector<8x128xf32>
    %36 = tpu.matmul %35, %34, %cst_25 {dimension_numbers = #tpu.dot_dimension_numbers<[1], [0], [0], [1], [0, 0, 1, 1], [], []>} : vector<8x128xbf16>, vector<128x128xbf16>, vector<8x128xf32> -> vector<8x128xf32>
    %c0_26 = arith.constant 0 : index
    %c0_27 = arith.constant 0 : index
    %37 = vector.load %arg11[%c0_26, %c0_27] : memref<1x128xf32, #tpu.memory_space<vmem>>, vector<1x128xf32>
    %38 = vector.broadcast %37 : vector<1x128xf32> to vector<8x128xf32>
    %39 = arith.addf %36, %38 : vector<8x128xf32>
    %cst_28 = arith.constant 0.000000e+00 : f32
    %40 = vector.broadcast %cst_28 : f32 to vector<8x128xf32>
    %41 = arith.maximumf %39, %40 : vector<8x128xf32>
    %c0_29 = arith.constant 0 : index
    %c0_30 = arith.constant 0 : index
    %42 = vector.load %arg12[%c0_29, %c0_30] : memref<128x128xbf16, #tpu.memory_space<vmem>>, vector<128x128xbf16>
    %43 = arith.truncf %41 : vector<8x128xf32> to vector<8x128xbf16>
    %cst_31 = arith.constant dense<0.000000e+00> : vector<8x128xf32>
    %44 = tpu.matmul %43, %42, %cst_31 {dimension_numbers = #tpu.dot_dimension_numbers<[1], [0], [0], [1], [0, 0, 1, 1], [], []>} : vector<8x128xbf16>, vector<128x128xbf16>, vector<8x128xf32> -> vector<8x128xf32>
    %c0_32 = arith.constant 0 : index
    %c0_33 = arith.constant 0 : index
    %45 = vector.load %arg13[%c0_32, %c0_33] : memref<1x128xf32, #tpu.memory_space<vmem>>, vector<1x128xf32>
    %46 = vector.broadcast %45 : vector<1x128xf32> to vector<8x128xf32>
    %47 = arith.addf %44, %46 : vector<8x128xf32>
    %cst_34 = arith.constant 0.000000e+00 : f32
    %48 = vector.broadcast %cst_34 : f32 to vector<8x128xf32>
    %49 = arith.maximumf %47, %48 : vector<8x128xf32>
    %c0_35 = arith.constant 0 : index
    %c0_36 = arith.constant 0 : index
    %50 = vector.load %arg14[%c0_35, %c0_36] : memref<128x128xbf16, #tpu.memory_space<vmem>>, vector<128x128xbf16>
    %51 = arith.truncf %49 : vector<8x128xf32> to vector<8x128xbf16>
    %cst_37 = arith.constant dense<0.000000e+00> : vector<8x128xf32>
    %52 = tpu.matmul %51, %50, %cst_37 {dimension_numbers = #tpu.dot_dimension_numbers<[1], [0], [0], [1], [0, 0, 1, 1], [], []>} : vector<8x128xbf16>, vector<128x128xbf16>, vector<8x128xf32> -> vector<8x128xf32>
    %c0_38 = arith.constant 0 : index
    %c0_39 = arith.constant 0 : index
    %53 = vector.load %arg15[%c0_38, %c0_39] : memref<1x128xf32, #tpu.memory_space<vmem>>, vector<1x128xf32>
    %54 = vector.broadcast %53 : vector<1x128xf32> to vector<8x128xf32>
    %55 = arith.addf %52, %54 : vector<8x128xf32>
    %cst_40 = arith.constant 0.000000e+00 : f32
    %56 = vector.broadcast %cst_40 : f32 to vector<8x128xf32>
    %57 = arith.maximumf %55, %56 : vector<8x128xf32>
    %c0_41 = arith.constant 0 : index
    %c0_42 = arith.constant 0 : index
    %58 = vector.load %arg16[%c0_41, %c0_42] : memref<128x128xbf16, #tpu.memory_space<vmem>>, vector<128x128xbf16>
    %59 = arith.truncf %57 : vector<8x128xf32> to vector<8x128xbf16>
    %cst_43 = arith.constant dense<0.000000e+00> : vector<8x128xf32>
    %60 = tpu.matmul %59, %58, %cst_43 {dimension_numbers = #tpu.dot_dimension_numbers<[1], [0], [0], [1], [0, 0, 1, 1], [], []>} : vector<8x128xbf16>, vector<128x128xbf16>, vector<8x128xf32> -> vector<8x128xf32>
    %c0_44 = arith.constant 0 : index
    %c0_45 = arith.constant 0 : index
    %61 = vector.load %arg17[%c0_44, %c0_45] : memref<1x128xf32, #tpu.memory_space<vmem>>, vector<1x128xf32>
    %62 = vector.broadcast %61 : vector<1x128xf32> to vector<8x128xf32>
    %63 = arith.addf %60, %62 : vector<8x128xf32>
    %64 = vector.extract_strided_slice %63 {offsets = [0, 0], sizes = [8, 1], strides = [1, 1]} : vector<8x128xf32> to vector<8x1xf32>
    %c0_46 = arith.constant 0 : index
    %c0_47 = arith.constant 0 : index
    %65 = vector.load %arg18[%c0_46, %c0_47] : memref<8x1xf32, #tpu.memory_space<vmem>>, vector<8x1xf32>
    tpu.vector_store %arg18[%c0_46, %c0_47], %64 {strides = array<i32>} : memref<8x1xf32, #tpu.memory_space<vmem>>, vector<8x1xf32>,
    return
  }
  func.func @transform_0(%arg0: i32) -> (i32, i32) {
    %c0_i32 = arith.constant 0 : i32
    %c0_i32_0 = arith.constant 0 : i32
    return %arg0, %c0_i32 : i32, i32
  }
  func.func @transform_1(%arg0: i32) -> (i32, i32) {
    %c0_i32 = arith.constant 0 : i32
    %c0_i32_0 = arith.constant 0 : i32
    return %arg0, %c0_i32 : i32, i32
  }
  func.func @transform_2(%arg0: i32) -> (i32, i32) {
    %c0_i32 = arith.constant 0 : i32
    %c0_i32_0 = arith.constant 0 : i32
    %c0_i32_1 = arith.constant 0 : i32
    return %c0_i32, %c0_i32_0 : i32, i32
  }
  func.func @transform_3(%arg0: i32) -> (i32, i32) {
    %c0_i32 = arith.constant 0 : i32
    %c0_i32_0 = arith.constant 0 : i32
    %c0_i32_1 = arith.constant 0 : i32
    return %c0_i32, %c0_i32_0 : i32, i32
  }
  func.func @transform_4(%arg0: i32) -> (i32, i32) {
    %c0_i32 = arith.constant 0 : i32
    %c0_i32_0 = arith.constant 0 : i32
    %c0_i32_1 = arith.constant 0 : i32
    return %c0_i32, %c0_i32_0 : i32, i32
  }
  func.func @transform_5(%arg0: i32) -> (i32, i32) {
    %c0_i32 = arith.constant 0 : i32
    %c0_i32_0 = arith.constant 0 : i32
    %c0_i32_1 = arith.constant 0 : i32
    return %c0_i32, %c0_i32_0 : i32, i32
  }
  func.func @transform_6(%arg0: i32) -> (i32, i32) {
    %c0_i32 = arith.constant 0 : i32
    %c0_i32_0 = arith.constant 0 : i32
    %c0_i32_1 = arith.constant 0 : i32
    return %c0_i32, %c0_i32_0 : i32, i32
  }
  func.func @transform_7(%arg0: i32) -> (i32, i32) {
    %c0_i32 = arith.constant 0 : i32
    %c0_i32_0 = arith.constant 0 : i32
    %c0_i32_1 = arith.constant 0 : i32
    return %c0_i32, %c0_i32_0 : i32, i32
  }
  func.func @transform_8(%arg0: i32) -> (i32, i32) {
    %c0_i32 = arith.constant 0 : i32
    %c0_i32_0 = arith.constant 0 : i32
    %c0_i32_1 = arith.constant 0 : i32
    return %c0_i32, %c0_i32_0 : i32, i32
  }
  func.func @transform_9(%arg0: i32) -> (i32, i32) {
    %c0_i32 = arith.constant 0 : i32
    %c0_i32_0 = arith.constant 0 : i32
    %c0_i32_1 = arith.constant 0 : i32
    return %c0_i32, %c0_i32_0 : i32, i32
  }
  func.func @transform_10(%arg0: i32) -> (i32, i32) {
    %c0_i32 = arith.constant 0 : i32
    %c0_i32_0 = arith.constant 0 : i32
    %c0_i32_1 = arith.constant 0 : i32
    return %c0_i32, %c0_i32_0 : i32, i32
  }
  func.func @transform_11(%arg0: i32) -> (i32, i32) {
    %c0_i32 = arith.constant 0 : i32
    %c0_i32_0 = arith.constant 0 : i32
    %c0_i32_1 = arith.constant 0 : i32
    return %c0_i32, %c0_i32_0 : i32, i32
  }
  func.func @transform_12(%arg0: i32) -> (i32, i32) {
    %c0_i32 = arith.constant 0 : i32
    %c0_i32_0 = arith.constant 0 : i32
    %c0_i32_1 = arith.constant 0 : i32
    return %c0_i32, %c0_i32_0 : i32, i32
  }
  func.func @transform_13(%arg0: i32) -> (i32, i32) {
    %c0_i32 = arith.constant 0 : i32
    %c0_i32_0 = arith.constant 0 : i32
    %c0_i32_1 = arith.constant 0 : i32
    return %c0_i32, %c0_i32_0 : i32, i32
  }
  func.func @transform_14(%arg0: i32) -> (i32, i32) {
    %c0_i32 = arith.constant 0 : i32
    %c0_i32_0 = arith.constant 0 : i32
    %c0_i32_1 = arith.constant 0 : i32
    return %c0_i32, %c0_i32_0 : i32, i32
  }
  func.func @transform_15(%arg0: i32) -> (i32, i32) {
    %c0_i32 = arith.constant 0 : i32
    %c0_i32_0 = arith.constant 0 : i32
    %c0_i32_1 = arith.constant 0 : i32
    return %c0_i32, %c0_i32_0 : i32, i32
  }
  func.func @transform_16(%arg0: i32) -> (i32, i32) {
    %c0_i32 = arith.constant 0 : i32
    %c0_i32_0 = arith.constant 0 : i32
    %c0_i32_1 = arith.constant 0 : i32
    return %c0_i32, %c0_i32_0 : i32, i32
  }
  func.func @transform_17(%arg0: i32) -> (i32, i32) {
    %c0_i32 = arith.constant 0 : i32
    %c0_i32_0 = arith.constant 0 : i32
    return %arg0, %c0_i32 : i32, i32
  }
}

</mosaic_0001>

<bundles_post_ra>
// kernel: penn_forward.1
= control target key start
LH: loop header
LB: loop body
LE: loop exit
PB: predicated region body
PF: predicated region fallthrough
CT: control target
= control target key end

     0   :  { %s2148_s0 = inlined_call_operand.hbm [shape: f32[8,27], index: 0, kind: input, shape index: {}]   ;;  %s2149_s1 = inlined_call_operand.hbm [shape: f32[8,13], index: 1, kind: input, shape index: {}]   ;;  %s2150_s2 = inlined_call_operand.hbm [shape: bf16[27,256], index: 2, kind: input, shape index: {}]   ;;  %s2151_s3 = inlined_call_operand.hbm [shape: bf16[13,256], index: 3, kind: input, shape index: {}]   ;;  %s2152_s4 = inlined_call_operand.vmem [shape: f32[1,256], index: 4, kind: input, shape index: {}]   ;;  %s2153_s5 = inlined_call_operand.hbm [shape: bf16[256,256], index: 5, kind: input, shape index: {}]   ;;  %s2154_s6 = inlined_call_operand.vmem [shape: f32[1,256], index: 6, kind: input, shape index: {}]   ;;  %s2155_s7 = inlined_call_operand.hbm [shape: bf16[256,128], index: 7, kind: input, shape index: {}]   ;;  %s2156_s8 = inlined_call_operand.vmem [shape: f32[1,128], index: 8, kind: input, shape index: {}]   ;;  %s2157_s9 = inlined_call_operand.hbm [shape: bf16[128,128], index: 9, kind: input, shape index: {}]   ;;  %s2158_s10 = inlined_call_operand.vmem [shape: f32[1,128], index: 10, kind: input, shape index: {}]   ;;  %s2159_s11 = inlined_call_operand.hbm [shape: bf16[128,128], index: 11, kind: input, shape index: {}]   ;;  %s2160_s12 = inlined_call_operand.vmem [shape: f32[1,128], index: 12, kind: input, shape index: {}]   ;;  %s2161_s13 = inlined_call_operand.hbm [shape: bf16[128,128], index: 13, kind: input, shape index: {}]   ;;  %s2162_s14 = inlined_call_operand.vmem [shape: f32[1,128], index: 14, kind: input, shape index: {}]   ;;  %s2163_s15 = inlined_call_operand.hbm [shape: bf16[128,128], index: 15, kind: input, shape index: {}]   ;;  %s2164_s16 = inlined_call_operand.vmem [shape: f32[1,128], index: 16, kind: input, shape index: {}]   ;;  %s2165_s17 = inlined_call_operand.vmem [shape: f32[8,1], index: 17, kind: output, shape index: {}]  }
   0x1   :  { %2172 = sst [smem:[#allocation24_spill]] %s2148_s0 }
   0x2   :  { %2173 = sst [smem:[#allocation25_spill]] %s2149_s1 }
   0x3   :  { %22 = vsyncpa [#allocation3], 0 }
   0x4   :  { %23 = vsyncpa [#allocation5], 0 }
   0x5   :  { %24 = vsyncpa [#allocation8], 0 }
   0x6   :  { %25 = vsyncpa [#allocation11], 0 }
   0x7   :  { %26 = vsyncpa [#allocation14], 0 }
   0x8   :  { %27 = vsyncpa [#allocation17], 0  ;;  %s1830_s24 = smov [#allocation4]   ;;  %s2174_s28 = sld [smem:[#allocation25_spill]] }
   0x9   :  { %s44_s25 = sshll.u32 %s1830_s24, 4  ;;  %s45_s25 = int_to_ptr.vmem [resolvable:$true] %s44_s25 }
   0xe   :  { %s1598_s29 = scalar_lea.hbm %s2174_s28, 128 }
   0xf   :  { %p1599_p0 = scmp.ne.s32.totalorder %s2174_s28, %s1598_s29  ;;  %p1602_p1 = scmp.lt.u32.totalorder %s1598_s29, %s2174_s28 }
  0x11   :  { %p1604_p2 = pnand %p1602_p1, %p1599_p0 }
  0x13   :  { %1607 = shalt.err (!%p1604_p2)
}
  0x14   :  { %s1608_s1 = scalar_lea.vmem %s45_s25, 128  ;;  %p1613_p4 = scmp.lt.s32.totalorder %s45_s25, %s45_s25 }
  0x15   :  { %p1609_p3 = scmp.ne.s32.totalorder %s45_s25, %s1608_s1  ;;  %p1614_p5 = scmp.lt.s32.totalorder %s1608_s1, %s1608_s1 }
  0x17   :  { %p1615_p6 = por %p1614_p5, %p1613_p4 }
  0x19   :  { %p1616_p7 = pnand %p1615_p6, %p1609_p3 }
  0x1b   :  { %1619 = shalt.err (!%p1616_p7)
}
  0x1c   :  { %47 = dma.hbm_to_vmem [thread:$0]  %s2174_s28, 128, %s45_s25, [#allocation5]  }
  0x1d   :  { %s1831_s22 = smov [#allocation7]   ;;  %s1832_s24 = smov [#allocation10]  }
  0x1e   :  { %s65_s23 = sshll.u32 %s1831_s22, 4  ;;  %s93_s26 = sshll.u32 %s1832_s24, 4  ;;  %s66_s23 = int_to_ptr.vmem [resolvable:$true] %s65_s23  ;;  %s94_s26 = int_to_ptr.vmem [resolvable:$true] %s93_s26 }
  0x1f   :  { %s1620_s0 = scalar_lea.hbm %s2151_s3, 256 }
  0x20   :  { %p1621_p8 = scmp.ne.s32.totalorder %s2151_s3, %s1620_s0  ;;  %p1624_p9 = scmp.lt.u32.totalorder %s1620_s0, %s2151_s3 }
  0x22   :  { %p1626_p10 = pnand %p1624_p9, %p1621_p8 }
  0x24   :  { %1629 = shalt.err (!%p1626_p10)
}
  0x25   :  { %s1630_s25 = scalar_lea.vmem %s66_s23, 256  ;;  %p1635_p12 = scmp.lt.s32.totalorder %s66_s23, %s66_s23 }
  0x26   :  { %p1631_p11 = scmp.ne.s32.totalorder %s66_s23, %s1630_s25  ;;  %p1636_p13 = scmp.lt.s32.totalorder %s1630_s25, %s1630_s25 }
  0x28   :  { %p1637_p0 = por %p1636_p13, %p1635_p12 }
  0x2a   :  { %p1638_p1 = pnand %p1637_p0, %p1631_p11 }
  0x2c   :  { %1641 = shalt.err (!%p1638_p1)
}
  0x2d   :  { %s2168_s28 = smov 128   ;;  %s2170_s20 = smov 8  }
  0x2e   :  { %71 = dma.hbm_to_vmem [thread:$0]  %s2151_s3, 256, %s66_s23, [#allocation8], %s2168_s28, %s2168_s28, %s2170_s20  }
  0x2f   :  { %s1642_s29 = scalar_lea.hbm %s2155_s7, 2048 }
  0x30   :  { %p1643_p2 = scmp.ne.s32.totalorder %s2155_s7, %s1642_s29  ;;  %p1646_p3 = scmp.lt.u32.totalorder %s1642_s29, %s2155_s7 }
  0x32   :  { %p1648_p4 = pnand %p1646_p3, %p1643_p2 }
  0x34   :  { %1651 = shalt.err (!%p1648_p4)
}
  0x35   :  { %s1652_s1 = scalar_lea.vmem %s94_s26, 2048  ;;  %p1657_p6 = scmp.lt.s32.totalorder %s94_s26, %s94_s26 }
  0x36   :  { %p1653_p5 = scmp.ne.s32.totalorder %s94_s26, %s1652_s1  ;;  %p1658_p7 = scmp.lt.s32.totalorder %s1652_s1, %s1652_s1 }
  0x38   :  { %p1659_p8 = por %p1658_p7, %p1657_p6 }
  0x3a   :  { %p1660_p9 = pnand %p1659_p8, %p1653_p5 }
  0x3c   :  { %1663 = shalt.err (!%p1660_p9)
}
  0x3d   :  { %s1835_s3 = smov 64   ;;  %s1836_s23 = smov 4  }
  0x3e   :  { %99 = dma.hbm_to_vmem [thread:$0]  %s2155_s7, 2048, %s94_s26, [#allocation11], %s1835_s3, %s1835_s3, %s1836_s23  }
  0x3f   :  { %s1837_s22 = smov [#allocation13]   ;;  %s1838_s27 = smov [#allocation2]  }
  0x40   :  { %s121_s24 = sshll.u32 %s1837_s22, 4  ;;  %s34_s29 = sshll.u32 %s1838_s27, 4  ;;  %s122_s24 = int_to_ptr.vmem [resolvable:$true] %s121_s24  ;;  %s35_s29 = int_to_ptr.vmem [resolvable:$true] %s34_s29 }
  0x41   :  { %s1664_s18 = scalar_lea.hbm %s2159_s11, 1024 }
  0x42   :  { %p1665_p10 = scmp.ne.s32.totalorder %s2159_s11, %s1664_s18  ;;  %p1668_p11 = scmp.lt.u32.totalorder %s1664_s18, %s2159_s11 }
  0x44   :  { %p1670_p12 = pnand %p1668_p11, %p1665_p10 }
  0x46   :  { %1673 = shalt.err (!%p1670_p12)
}
  0x47   :  { %s1674_s7 = scalar_lea.vmem %s122_s24, 1024  ;;  %p1679_p0 = scmp.lt.s32.totalorder %s122_s24, %s122_s24 }
  0x48   :  { %p1675_p13 = scmp.ne.s32.totalorder %s122_s24, %s1674_s7  ;;  %p1680_p1 = scmp.lt.s32.totalorder %s1674_s7, %s1674_s7 }
  0x4a   :  { %p1681_p2 = por %p1680_p1, %p1679_p0 }
  0x4c   :  { %p1682_p3 = pnand %p1681_p2, %p1675_p13 }
  0x4e   :  { %1685 = shalt.err (!%p1682_p3)
}
  0x4f   :  { %127 = dma.hbm_to_vmem [thread:$0]  %s2159_s11, 1024, %s122_s24, [#allocation14], %s1835_s3, %s1835_s3, %s1836_s23  }
  0x50   :  { %s2175_s20 = sld [smem:[#allocation24_spill]] }
  0x56   :  { %s1686_s22 = scalar_lea.hbm %s2175_s20, 128 }
  0x57   :  { %p1687_p4 = scmp.ne.s32.totalorder %s2175_s20, %s1686_s22  ;;  %p1690_p5 = scmp.lt.u32.totalorder %s1686_s22, %s2175_s20 }
  0x59   :  { %p1692_p6 = pnand %p1690_p5, %p1687_p4 }
  0x5b   :  { %1695 = shalt.err (!%p1692_p6)
}
  0x5c   :  { %s1696_s19 = scalar_lea.vmem %s35_s29, 128  ;;  %p1701_p8 = scmp.lt.s32.totalorder %s35_s29, %s35_s29 }
  0x5d   :  { %p1697_p7 = scmp.ne.s32.totalorder %s35_s29, %s1696_s19  ;;  %p1702_p9 = scmp.lt.s32.totalorder %s1696_s19, %s1696_s19 }
  0x5f   :  { %p1703_p10 = por %p1702_p9, %p1701_p8 }
  0x61   :  { %p1704_p11 = pnand %p1703_p10, %p1697_p7 }
  0x63   :  { %1707 = shalt.err (!%p1704_p11)
}
  0x64   :  { %37 = dma.hbm_to_vmem [thread:$0]  %s2175_s20, 128, %s35_s29, [#allocation3]  }
  0x65   :  { %s1839_s1 = smov [#allocation6]   ;;  %s1840_s26 = smov [#allocation9]  }
  0x66   :  { %s53_s7 = sshll.u32 %s1839_s1, 4  ;;  %s79_s25 = sshll.u32 %s1840_s26, 4  ;;  %s54_s7 = int_to_ptr.vmem [resolvable:$true] %s53_s7  ;;  %s80_s25 = int_to_ptr.vmem [resolvable:$true] %s79_s25 }
  0x67   :  { %s1708_s22 = scalar_lea.hbm %s2150_s2, 512 }
  0x68   :  { %p1709_p12 = scmp.ne.s32.totalorder %s2150_s2, %s1708_s22  ;;  %p1712_p13 = scmp.lt.u32.totalorder %s1708_s22, %s2150_s2 }
  0x6a   :  { %p1714_p0 = pnand %p1712_p13, %p1709_p12 }
  0x6c   :  { %1717 = shalt.err (!%p1714_p0)
}
  0x6d   :  { %s1718_s29 = scalar_lea.vmem %s54_s7, 512  ;;  %p1723_p2 = scmp.lt.s32.totalorder %s54_s7, %s54_s7 }
  0x6e   :  { %p1719_p1 = scmp.ne.s32.totalorder %s54_s7, %s1718_s29  ;;  %p1724_p3 = scmp.lt.s32.totalorder %s1718_s29, %s1718_s29 }
  0x70   :  { %p1725_p4 = por %p1724_p3, %p1723_p2 }
  0x72   :  { %p1726_p5 = pnand %p1725_p4, %p1719_p1 }
  0x74   :  { %1729 = shalt.err (!%p1726_p5)
}
  0x75   :  { %s2176_s20 = smov 8   ;;  %s2177_s19 = smov 128  }
  0x76   :  { %59 = dma.hbm_to_vmem [thread:$0]  %s2150_s2, 512, %s54_s7, [#allocation5], %s2177_s19, %s2177_s19, %s2176_s20  }
  0x77   :  { %s1730_s21 = scalar_lea.hbm %s2153_s5, 4096 }
  0x78   :  { %p1731_p6 = scmp.ne.s32.totalorder %s2153_s5, %s1730_s21  ;;  %p1734_p7 = scmp.lt.u32.totalorder %s1730_s21, %s2153_s5 }
  0x7a   :  { %p1736_p8 = pnand %p1734_p7, %p1731_p6 }
  0x7c   :  { %1739 = shalt.err (!%p1736_p8)
}
  0x7d   :  { %s1740_s30 = scalar_lea.vmem %s80_s25, 4096  ;;  %p1745_p10 = scmp.lt.s32.totalorder %s80_s25, %s80_s25 }
  0x7e   :  { %p1741_p9 = scmp.ne.s32.totalorder %s80_s25, %s1740_s30  ;;  %p1746_p11 = scmp.lt.s32.totalorder %s1740_s30, %s1740_s30 }
  0x80   :  { %p1747_p12 = por %p1746_p11, %p1745_p10 }
  0x82   :  { %p1748_p13 = pnand %p1747_p12, %p1741_p9 }
  0x84   :  { %1751 = shalt.err (!%p1748_p13)
}
  0x85   :  { %85 = dma.hbm_to_vmem [thread:$0]  %s2153_s5, 4096, %s80_s25, [#allocation8], %s2177_s19, %s2177_s19, %s2176_s20  }
  0x86   :  { %s1841_s18 = smov [#allocation12]   ;;  %s1842_s11 = smov [#allocation15]  }
  0x87   :  { %s107_s29 = sshll.u32 %s1841_s18, 4  ;;  %s135_s24 = sshll.u32 %s1842_s11, 4  ;;  %s108_s29 = int_to_ptr.vmem [resolvable:$true] %s107_s29  ;;  %s136_s24 = int_to_ptr.vmem [resolvable:$true] %s135_s24 }
  0x88   :  { %s1752_s21 = scalar_lea.hbm %s2157_s9, 1024 }
  0x89   :  { %p1753_p0 = scmp.ne.s32.totalorder %s2157_s9, %s1752_s21  ;;  %p1756_p1 = scmp.lt.u32.totalorder %s1752_s21, %s2157_s9 }
  0x8b   :  { %p1758_p2 = pnand %p1756_p1, %p1753_p0 }
  0x8d   :  { %1761 = shalt.err (!%p1758_p2)
}
  0x8e   :  { %s1762_s5 = scalar_lea.vmem %s108_s29, 1024  ;;  %p1767_p4 = scmp.lt.s32.totalorder %s108_s29, %s108_s29 }
  0x8f   :  { %p1763_p3 = scmp.ne.s32.totalorder %s108_s29, %s1762_s5  ;;  %p1768_p5 = scmp.lt.s32.totalorder %s1762_s5, %s1762_s5 }
  0x91   :  { %p1769_p6 = por %p1768_p5, %p1767_p4 }
  0x93   :  { %p1770_p7 = pnand %p1769_p6, %p1763_p3 }
  0x95   :  { %1773 = shalt.err (!%p1770_p7)
}
  0x96   :  { %113 = dma.hbm_to_vmem [thread:$0]  %s2157_s9, 1024, %s108_s29, [#allocation11], %s1835_s3, %s1835_s3, %s1836_s23  }
  0x97   :  { %s1774_s2 = scalar_lea.hbm %s2161_s13, 1024 }
  0x98   :  { %p1775_p8 = scmp.ne.s32.totalorder %s2161_s13, %s1774_s2  ;;  %p1778_p9 = scmp.lt.u32.totalorder %s1774_s2, %s2161_s13 }
  0x9a   :  { %p1780_p10 = pnand %p1778_p9, %p1775_p8 }
  0x9c   :  { %1783 = shalt.err (!%p1780_p10)
}
  0x9d   :  { %s1784_s26 = scalar_lea.vmem %s136_s24, 1024  ;;  %p1789_p12 = scmp.lt.s32.totalorder %s136_s24, %s136_s24 }
  0x9e   :  { %p1785_p11 = scmp.ne.s32.totalorder %s136_s24, %s1784_s26  ;;  %p1790_p13 = scmp.lt.s32.totalorder %s1784_s26, %s1784_s26 }
  0xa0   :  { %p1791_p0 = por %p1790_p13, %p1789_p12 }
  0xa2   :  { %p1792_p1 = pnand %p1791_p0, %p1785_p11 }
  0xa4   :  { %1795 = shalt.err (!%p1792_p1)
}
  0xa5   :  { %141 = dma.hbm_to_vmem [thread:$0]  %s2161_s13, 1024, %s136_s24, [#allocation14], %s1835_s3, %s1835_s3, %s1836_s23  }
  0xa6   :  { %s1843_s21 = smov [#allocation16]   ;;  %s1796_s0 = scalar_lea.hbm %s2163_s15, 1024 }
  0xa7   :  { %s149_s28 = sshll.u32 %s1843_s21, 4  ;;  %p1797_p2 = scmp.ne.s32.totalorder %s2163_s15, %s1796_s0  ;;  %s150_s28 = int_to_ptr.vmem [resolvable:$true] %s149_s28 }
  0xa8   :  { %p1800_p3 = scmp.lt.u32.totalorder %s1796_s0, %s2163_s15 }
  0xaa   :  { %p1802_p4 = pnand %p1800_p3, %p1797_p2 }
  0xac   :  { %1805 = shalt.err (!%p1802_p4)
}
  0xad   :  { %s1806_s30 = scalar_lea.vmem %s150_s28, 1024  ;;  %p1811_p6 = scmp.lt.s32.totalorder %s150_s28, %s150_s28 }
  0xae   :  { %p1807_p5 = scmp.ne.s32.totalorder %s150_s28, %s1806_s30  ;;  %p1812_p7 = scmp.lt.s32.totalorder %s1806_s30, %s1806_s30 }
  0xb0   :  { %p1813_p8 = por %p1812_p7, %p1811_p6 }
  0xb2   :  { %p1814_p9 = pnand %p1813_p8, %p1807_p5 }
  0xb4   :  { %1817 = shalt.err (!%p1814_p9)
}
  0xb5   :  { %155 = dma.hbm_to_vmem [thread:$0]  %s2163_s15, 1024, %s150_s28, [#allocation17], %s1835_s3, %s1835_s3, %s1836_s23  }
  0xb6   :  { %1818 = dma.done.wait [#allocation3], 128  }
  0xb7   :  { %1819 = vsyncadd [#allocation3], 4294967168 }
  0xb8   :  { %1820 = dma.done.wait [#allocation5], 640  }
  0xb9   :  { %1821 = vsyncadd [#allocation5], 4294966656 }
  0xba   :  { %1822 = dma.done.wait [#allocation8], 4352  }
  0xbb   :  { %1823 = vsyncadd [#allocation8], 4294962944 }
  0xbc   :  { %1824 = dma.done.wait [#allocation11], 3072  }
  0xbd   :  { %1825 = vsyncadd [#allocation11], 4294964224 }
  0xbe   :  { %1826 = dma.done.wait [#allocation14], 2048  }
  0xbf   :  { %1827 = vsyncadd [#allocation14], 4294965248 }
  0xc0   :  { %1828 = dma.done.wait [#allocation17], 1024  }
  0xc1   :  { %1829 = vsyncadd [#allocation17], 4294966272  ;;  %vm211_vm0 = vcmask 1045504   ;;  %v1844_v0 = vmov 0   ;;  %vm212_vm1 = vcmask 1046528   ;;  %v1845_v1 = vmov 65535  }
  0xc2   :  { %253 = vmatprep.mubr.bf16.mxu1 %v1844_v0  ;;  %v213_v2 = vsel %vm211_vm0, 4294967295, %v1845_v1  ;;  %vm284_vm2 = vcmask 1044480   ;;  %v1493_v4 = vld [vmem:[#allocation7 + $0x4] ss:$8 sps:$4 sm:$0x7f]   ;;  %v195_v7 = vld [vmem:[#allocation4] sm:$0xff] }
  0xc3   :  { %v214_v3 = vsel %vm212_vm1, %v213_v2, 0  ;;  %v285_v5 = vsel %vm284_vm2, 4294967295, %v1845_v1  ;;  %v1497_v6 = vld [vmem:[#allocation7] ss:$8 sps:$4 sm:$0x7f]   ;;  %v198_v15 = vpack.c.bf16 %v195_v7, %v195_v7  ;;  %vm207_vm3 = vcmask 105472  }
  0xc4   :  { %v219_v8 = vand.u32 %v1493_v4, %v214_v3  ;;  %v1495_v9 = vld [vmem:[#allocation6 + $0x10] ss:$8 sps:$4 sm:$0x3f]   ;;  %v286_v10 = vsel %vm211_vm0, %v285_v5, 0  ;;  %v216_v11 = vand.u32 %v1497_v6, %v214_v3  ;;  %v1498_v12 = vld [vmem:[#allocation6] ss:$8 sps:$4 sm:$0xff]  }
  0xc5   :  { %v1500_v13 = vld [vmem:[#allocation6 + $0x4] ss:$8 sps:$4 sm:$0xff]   ;;  %v1501_v14 = vld [vmem:[#allocation6 + $0x14] ss:$8 sps:$4 sm:$0x3f]   ;;  %v288_v22 = vand.u32 %v1495_v9, %v286_v10  ;;  %vm280_vm4 = vcmask 220160  }
  0xc6   :  { %221 = vmatprep.subr.bf16.mxu1 %v219_v8  ;;  %v1502_v16 = vld [vmem:[#allocation9 + $0x4] ss:$8 sps:$4 sm:$0xff]   ;;  %v1504_v17 = vld [vmem:[#allocation9] ss:$8 sps:$4 sm:$0xff]   ;;  %v291_v18 = vand.u32 %v1501_v14, %v286_v10  ;;  %v1505_v19 = vld [vmem:[#allocation9 + $0x14] ss:$8 sps:$4 sm:$0xff]  }
  0xc7   :  { %222 = vmatpush1.bf16.msra.mxu1 %v216_v11  ;;  %556 = vmatprep.subr.bf16.mxu0 %v1502_v16  ;;  %v1507_v20 = vld [vmem:[#allocation9 + $0x10] ss:$8 sps:$4 sm:$0xff]   ;;  %v1508_v21 = vld [vmem:[#allocation9 + $0x24] ss:$8 sps:$4 sm:$0xff]   ;;  %v1510_v24 = vld [vmem:[#allocation9 + $0x20] ss:$8 sps:$4 sm:$0xff]  }
  0xc8   :  { %293 = vmatprep.subr.bf16.mxu1 %v1500_v13  ;;  %557 = vmatpush1.bf16.msra.mxu0 %v1504_v17  ;;  %v189_v23 = vld [vmem:[#allocation2] sm:$0xff]  ;;  %v1511_v26 = vld [vmem:[#allocation9 + $0x34] ss:$8 sps:$4 sm:$0xff]   ;;  %v1513_v27 = vld [vmem:[#allocation9 + $0x30] ss:$8 sps:$4 sm:$0xff]   ;;  %vm1847_vm5 = vmmov 0  }
  0xc9   :  { %558 = vmatprep.subr.bf16.mxu0 %v1505_v19  ;;  %v194_v25 = vpack.c.bf16 %v189_v23, %v189_v23  ;;  %v1514_v28 = vld [vmem:[#allocation9 + $0x44] ss:$8 sps:$4 sm:$0xff]   ;;  %v1516_v29 = vld [vmem:[#allocation9 + $0x40] ss:$8 sps:$4 sm:$0xff]   ;;  %v1517_v30 = vld [vmem:[#allocation9 + $0x54] ss:$8 sps:$4 sm:$0xff]  }
  0xca   :  { %1246 = vmatmul.mubr.msk.bf16.vlgmr.msra.gmra.mrb[0].mxu1 %vm207_vm3, %v198_v15  ;;  %v1519_v31 = vld [vmem:[#allocation9 + $0x50] ss:$8 sps:$4 sm:$0xff]   ;;  %v1520_v32 = vld [vmem:[#allocation9 + $0x64] ss:$8 sps:$4 sm:$0xff]   ;;  %v1522_v33 = vld [vmem:[#allocation9 + $0x60] ss:$8 sps:$4 sm:$0xff]  }
  0xcb   :  { %294 = vmatpush1.bf16.msra.mxu1 %v1498_v12  ;;  %325 = vmatprep.mubr.bf16.mxu1 %v1844_v0  ;;  %v1523_v34 = vld [vmem:[#allocation9 + $0x74] ss:$8 sps:$4 sm:$0xff]   ;;  %v1525_v35 = vld [vmem:[#allocation9 + $0x70] ss:$8 sps:$4 sm:$0xff]   ;;  %v1526_v36 = vld [vmem:[#allocation9 + $0x84] ss:$8 sps:$4 sm:$0xff]   ;;  %v336_v0 = vlaneseq }
  0xcc   :  { %295 = vmatprep.subr.bf16.mxu1 %v291_v18  ;;  %559 = vmatpush1.bf16.msra.mxu0 %v1507_v20  ;;  %v1528_v37 = vld [vmem:[#allocation9 + $0x80] ss:$8 sps:$4 sm:$0xff]   ;;  %v1529_v38 = vld [vmem:[#allocation9 + $0x94] ss:$8 sps:$4 sm:$0xff]   ;;  %v1531_v39 = vld [vmem:[#allocation9 + $0x90] ss:$8 sps:$4 sm:$0xff]  }
  0xcd   :  { %560 = vmatprep.subr.bf16.mxu0 %v1508_v21  ;;  %v1532_v40 = vld [vmem:[#allocation9 + $0xa4] ss:$8 sps:$4 sm:$0xff]   ;;  %v1534_v41 = vld [vmem:[#allocation9 + $0xa0] ss:$8 sps:$4 sm:$0xff]   ;;  %v1535_v42 = vld [vmem:[#allocation9 + $0xb4] ss:$8 sps:$4 sm:$0xff]  }
  0xce   :  { %v1537_v43 = vld [vmem:[#allocation9 + $0xb0] ss:$8 sps:$4 sm:$0xff]   ;;  %v1538_v44 = vld [vmem:[#allocation9 + $0xc4] ss:$8 sps:$4 sm:$0xff]   ;;  %v1540_v45 = vld [vmem:[#allocation9 + $0xc0] ss:$8 sps:$4 sm:$0xff]  }
  0xcf   :  { %296 = vmatpush1.bf16.msra.mxu1 %v288_v22  ;;  %v1541_v46 = vld [vmem:[#allocation9 + $0xd4] ss:$8 sps:$4 sm:$0xff]   ;;  %v1543_v47 = vld [vmem:[#allocation9 + $0xd0] ss:$8 sps:$4 sm:$0xff]   ;;  %v1544_v48 = vld [vmem:[#allocation9 + $0xe4] ss:$8 sps:$4 sm:$0xff]  }
  0xd0   :  { %561 = vmatpush1.bf16.msra.mxu0 %v1510_v24  ;;  %v1546_v49 = vld [vmem:[#allocation9 + $0xe0] ss:$8 sps:$4 sm:$0xff]   ;;  %v1547_v50 = vld [vmem:[#allocation9 + $0xf4] ss:$8 sps:$4 sm:$0xff]   ;;  %v1549_v51 = vld [vmem:[#allocation9 + $0xf0] ss:$8 sps:$4 sm:$0xff]  }
  0xd1   :  { %562 = vmatprep.subr.bf16.mxu0 %v1511_v26  ;;  %v1550_v52 = vld [vmem:[#allocation10 + $0x40] sm:$0xff]   ;;  %v1552_v54 = vld [vmem:[#allocation10 + $0x48] sm:$0xff]   ;;  %v1554_v56 = vld [vmem:[#allocation10 + $0x50] sm:$0xff]   ;;  %v337_v1 = vshrl.u32 %v336_v0, 7  ;;  %vm1232_vm7 = vcmask 7168  }
  0xd2   :  { %1251 = vmatmul.mubr.msk.bf16.vlgmr.msra.gmra.mrb[4].mxu1 %vm280_vm4, %v194_v25  ;;  %v1551_v53 = vld [vmem:[#allocation10] sm:$0xff]   ;;  %1337 = vmatprep.subr.bf16.mxu1 %v1550_v52  ;;  %v1553_v55 = vld [vmem:[#allocation10 + $0x8] sm:$0xff]   ;;  %v1555_v57 = vld [vmem:[#allocation10 + $0x10] sm:$0xff]  }
  0xd3   :  { %1338 = vmatpush3.bf16.msra.mxu1 %v1551_v53  ;;  %v1556_v58 = vld [vmem:[#allocation10 + $0x58] sm:$0xff]   ;;  %v1558_v60 = vld [vmem:[#allocation10 + $0x60] sm:$0xff]   ;;  %v1560_v62 = vld [vmem:[#allocation10 + $0x68] sm:$0xff]   ;;  %v338_v6 = vsub.s32 0, %v337_v1  ;;  %v342_v8 = vsub.s32 1, %v337_v1 }
  0xd4   :  { %563 = vmatpush1.bf16.msra.mxu0 %v1513_v27  ;;  %1339 = vmatprep.subr.bf16.mxu1 %v1552_v54  ;;  %v1557_v59 = vld [vmem:[#allocation10 + $0x18] sm:$0xff]   ;;  %v1559_v61 = vld [vmem:[#allocation10 + $0x20] sm:$0xff]   ;;  %v1561_v63 = vld [vmem:[#allocation10 + $0x28] sm:$0xff]   ;;  %v1846_v27 = vmov 0.0  }
  0xd5   :  { %564 = vmatprep.subr.bf16.mxu0 %v1514_v28  ;;  %v334_v7 = vld [vmem:[%s2152_s4] sm:$0x3]  ;;  %v1562_v23 = vld [vmem:[#allocation10 + $0x70] sm:$0xff]   ;;  %v1564_v25 = vld [vmem:[#allocation10 + $0x78] sm:$0xff]  }
  0xd6   :  { %v339_v9 = vrot.slane %v334_v7, %v338_v6  ;;  %v343_v11 = vrot.slane %v334_v7, %v342_v8  ;;  %v1563_v24 = vld [vmem:[#allocation10 + $0x30] sm:$0xff]   ;;  %v1565_v26 = vld [vmem:[#allocation10 + $0x38] sm:$0xff]   ;;  %v384_v28 = vld [vmem:[%s2154_s6] sm:$0x3] }
  0xd7   :  { %1340 = vmatpush3.bf16.msra.mxu1 %v1553_v55  ;;  %v1577_v52 = vld [vmem:[#allocation13 + $0x18] sm:$0xff]   ;;  %v1578_v53 = vld [vmem:[#allocation13 + $0x20] sm:$0xff]   ;;  %v1579_v54 = vld [vmem:[#allocation13 + $0x28] sm:$0xff]  }
  0xd8   :  { %565 = vmatpush1.bf16.msra.mxu0 %v1516_v29  ;;  %1341 = vmatprep.subr.bf16.mxu1 %v1554_v56  ;;  %v389_v29 = vrot.slane %v384_v28, %v338_v6  ;;  %v1284_v56 = vld [vmem:[%s2156_s8] ss:$0 sm:$0xff]  ;;  %v1584_v6 = vld [vmem:[#allocation15 + $0x10] sm:$0xff]   ;;  %v1585_v7 = vld [vmem:[#allocation15 + $0x18] sm:$0xff]  }
  0xd9   :  { %566 = vmatprep.subr.bf16.mxu0 %v1517_v30  ;;  %v393_v30 = vrot.slane %v384_v28, %v342_v8  ;;  %v1586_v8 = vld [vmem:[#allocation15 + $0x20] sm:$0xff]  }
  0xdb   :  { %1342 = vmatpush3.bf16.msra.mxu1 %v1555_v57 }
  0xdc   :  { %567 = vmatpush1.bf16.msra.mxu0 %v1519_v31  ;;  %1343 = vmatprep.subr.bf16.mxu1 %v1556_v58  ;;  %v777_v58 = vand.u32 127, %v336_v0  ;;  %v1582_v0 = vld [vmem:[#allocation15] sm:$0xff]  }
  0xdd   :  { %568 = vmatprep.subr.bf16.mxu0 %v1520_v32 }
  0xde   :  { %vm778_vm6 = vcmp.lt.s32.totalorder %v777_v58, 100 }
  0xdf   :  { %1344 = vmatpush3.bf16.msra.mxu1 %v1557_v59 }
  0xe0   :  { %569 = vmatpush1.bf16.msra.mxu0 %v1522_v33  ;;  %1345 = vmatprep.subr.bf16.mxu1 %v1558_v60 }
  0xe1   :  { %570 = vmatprep.subr.bf16.mxu0 %v1523_v34 }
  0xe3   :  { %1346 = vmatpush3.bf16.msra.mxu1 %v1559_v61 }
  0xe4   :  { %571 = vmatpush1.bf16.msra.mxu0 %v1525_v35  ;;  %1347 = vmatprep.subr.bf16.mxu1 %v1560_v62 }
  0xe5   :  { %572 = vmatprep.subr.bf16.mxu0 %v1526_v36 }
  0xe7   :  { %1348 = vmatpush3.bf16.msra.mxu1 %v1561_v63 }
  0xe8   :  { %573 = vmatpush1.bf16.msra.mxu0 %v1528_v37  ;;  %1349 = vmatprep.subr.bf16.mxu1 %v1562_v23  ;;  %v1593_v23 = vld [vmem:[#allocation16 + $0x18] sm:$0xff]  }
  0xe9   :  { %574 = vmatprep.subr.bf16.mxu0 %v1529_v38 }
  0xeb   :  { %1350 = vmatpush3.bf16.msra.mxu1 %v1563_v24  ;;  %v1594_v24 = vld [vmem:[#allocation16 + $0x20] sm:$0xff]  }
  0xec   :  { %575 = vmatpush1.bf16.msra.mxu0 %v1531_v39  ;;  %1351 = vmatprep.subr.bf16.mxu1 %v1564_v25  ;;  %v1595_v25 = vld [vmem:[#allocation16 + $0x28] sm:$0xff]  }
  0xed   :  { %576 = vmatprep.subr.bf16.mxu0 %v1532_v40  ;;  %v1566_v40 = vld [vmem:[#allocation12] sm:$0xff]  }
  0xef   :  { %1352 = vmatpush3.bf16.msra.mxu1 %v1565_v26  ;;  %v1310_v26 = vld [vmem:[%s2160_s12] ss:$0 sm:$0xff] }
  0xf0   :  { %577 = vmatpush1.bf16.msra.mxu0 %v1534_v41  ;;  %1395 = vmatprep.subr.bf16.mxu1 %v1846_v27 }
  0xf1   :  { %578 = vmatprep.subr.bf16.mxu0 %v1535_v42  ;;  %v1567_v42 = vld [vmem:[#allocation12 + $0x8] sm:$0xff]  }
  0xf4   :  { %579 = vmatpush1.bf16.msra.mxu0 %v1537_v43  ;;  %v1568_v43 = vld [vmem:[#allocation12 + $0x10] sm:$0xff]  }
  0xf5   :  { %580 = vmatprep.subr.bf16.mxu0 %v1538_v44  ;;  %v1569_v44 = vld [vmem:[#allocation12 + $0x18] sm:$0xff]  }
  0xf8   :  { %581 = vmatpush1.bf16.msra.mxu0 %v1540_v45  ;;  %v1570_v45 = vld [vmem:[#allocation12 + $0x20] sm:$0xff]  }
  0xf9   :  { %582 = vmatprep.subr.bf16.mxu0 %v1541_v46  ;;  %v1571_v46 = vld [vmem:[#allocation12 + $0x28] sm:$0xff]  }
  0xfc   :  { %583 = vmatpush1.bf16.msra.mxu0 %v1543_v47  ;;  %v1572_v47 = vld [vmem:[#allocation12 + $0x30] sm:$0xff]  }
  0xfd   :  { %584 = vmatprep.subr.bf16.mxu0 %v1544_v48  ;;  %v1573_v48 = vld [vmem:[#allocation12 + $0x38] sm:$0xff]  }
 0x100   :  { %585 = vmatpush1.bf16.msra.mxu0 %v1546_v49  ;;  %v1574_v49 = vld [vmem:[#allocation13] sm:$0xff]  }
 0x101   :  { %586 = vmatprep.subr.bf16.mxu0 %v1547_v50  ;;  %v1575_v50 = vld [vmem:[#allocation13 + $0x8] sm:$0xff]  }
 0x104   :  { %587 = vmatpush1.bf16.msra.mxu0 %v1549_v51  ;;  %v1576_v51 = vld [vmem:[#allocation13 + $0x10] sm:$0xff]  }
 0x105   :  { %1415 = vmatprep.subr.bf16.mxu0 %v1846_v27 }
 0x19d   :  { %v255_v2 = vpop.f32.mrb[0].mxu1 }
 0x19e   :  { %v257_v3 = vpop.f32.mrb[1].mxu1 }
 0x19f   :  { %v259_v4 = vpop.f32.mrb[2].mxu1 }
 0x1a0   :  { %v260_v5 = vpop.f32.mrb[3].mxu1  ;;  %v1581_v4 = vld [vmem:[#allocation13 + $0x38] sm:$0xff]  }
 0x1a1   :  { %v1583_v5 = vld [vmem:[#allocation15 + $0x8] sm:$0xff]  }
 0x1a5   :  { %v327_v10 = vpop.f32.mrb[4].mxu1 }
 0x1a6   :  { %v328_v12 = vadd.f32 %v327_v10, %v255_v2  ;;  %v329_v13 = vpop.f32.mrb[5].mxu1  ;;  %v1301_v10 = vld [vmem:[%s2158_s10] ss:$0 sm:$0xff] }
 0x1a7   :  { %v330_v14 = vadd.f32 %v329_v13, %v257_v3  ;;  %v331_v15 = vpop.f32.mrb[6].mxu1  ;;  %v1580_v3 = vld [vmem:[#allocation13 + $0x30] sm:$0xff]  }
 0x1a8   :  { %v346_v16 = vadd.f32 %v339_v9, %v328_v12  ;;  %v332_v17 = vpop.f32.mrb[7].mxu1  ;;  %v1587_v9 = vld [vmem:[#allocation15 + $0x28] sm:$0xff]  }
 0x1a9   :  { %v347_v18 = vadd.f32 %v343_v11, %v330_v14 }
 0x1aa   :  { %v348_v19 = vmax.f32 %v346_v16, 0.0 }
 0x1ab   :  { %v349_v20 = vmax.f32 %v347_v18, 0.0  ;;  %v1588_v18 = vld [vmem:[#allocation15 + $0x30] sm:$0xff]  }
 0x1ac   :  { %v382_v22 = vpack.c.bf16 %v348_v19, %v348_v19  ;;  %v1589_v19 = vld [vmem:[#allocation15 + $0x38] sm:$0xff]  }
 0x1ad   :  { %v383_v21 = vpack.c.bf16 %v349_v20, %v349_v20  ;;  %v1590_v20 = vld [vmem:[#allocation16] sm:$0xff]  }
 0x1af   :  { %588 = vmatprep.mubr.bf16.mxu0 %v383_v21  ;;  %v1591_v21 = vld [vmem:[#allocation16 + $0x8] sm:$0xff]  }
 0x1b0   :  { %589 = vmatmul.mubr.bf16.vlgmr.msra.gmra.mrb[0].mxu0 %v382_v22  ;;  %v1592_v22 = vld [vmem:[#allocation16 + $0x10] sm:$0xff]  }
 0x1b1   :  { %1431 = vmatprep.mubr.msk.bf16.mxu0 %vm1847_vm5, %v1846_v27  ;;  %1416 = vmatpush3.bf16.msra.mxu0 %v1574_v49 }
 0x1b2   :  { %1417 = vmatprep.subr.bf16.mxu0 %v1846_v27 }
 0x1b5   :  { %1418 = vmatpush3.bf16.msra.mxu0 %v1575_v50 }
 0x1b6   :  { %1419 = vmatprep.subr.bf16.mxu0 %v1846_v27 }
 0x1b9   :  { %1420 = vmatpush3.bf16.msra.mxu0 %v1576_v51 }
 0x1ba   :  { %1421 = vmatprep.subr.bf16.mxu0 %v1846_v27 }
 0x1bd   :  { %1422 = vmatpush3.bf16.msra.mxu0 %v1577_v52 }
 0x1be   :  { %1423 = vmatprep.subr.bf16.mxu0 %v1846_v27 }
 0x1c1   :  { %1424 = vmatpush3.bf16.msra.mxu0 %v1578_v53 }
 0x1c2   :  { %1425 = vmatprep.subr.bf16.mxu0 %v1846_v27 }
 0x1c5   :  { %1426 = vmatpush3.bf16.msra.mxu0 %v1579_v54 }
 0x1c6   :  { %1427 = vmatprep.subr.bf16.mxu0 %v1846_v27 }
 0x1c9   :  { %1428 = vmatpush3.bf16.msra.mxu0 %v1580_v3 }
 0x1ca   :  { %1429 = vmatprep.subr.bf16.mxu0 %v1846_v27 }
 0x1cd   :  { %1430 = vmatpush3.bf16.msra.mxu0 %v1581_v4 }
 0x1ce   :  { %1455 = vmatprep.subr.bf16.mxu0 %v1846_v27 }
 0x283   :  { %v590_v31 = vpop.f32.mrb[0].mxu0 }
 0x284   :  { %v591_v32 = vadd.f32 %v590_v31, %v389_v29  ;;  %v592_v33 = vpop.f32.mrb[1].mxu0 }
 0x285   :  { %v593_v34 = vadd.f32 %v592_v33, %v393_v30  ;;  %v594_v35 = vpop.f32.mrb[2].mxu0 }
 0x286   :  { %v597_v36 = vmax.f32 %v591_v32, 0.0  ;;  %v595_v37 = vpop.f32.mrb[3].mxu0  ;;  %v1596_v35 = vld [vmem:[#allocation16 + $0x30] sm:$0xff]  }
 0x287   :  { %v598_v38 = vmax.f32 %v593_v34, 0.0  ;;  %v1319_v37 = vld [vmem:[%s2162_s14] ss:$0 sm:$0xff] }
 0x288   :  { %v631_v41 = vpack.c.bf16 %v597_v36, %v597_v36  ;;  %v1597_v36 = vld [vmem:[#allocation16 + $0x38] sm:$0xff]  }
 0x289   :  { %v632_v39 = vpack.c.bf16 %v598_v38, %v598_v38 }
 0x28b   :  { %768 = vmatprep.mubr.bf16.mxu1 %v632_v39 }
 0x28c   :  { %769 = vmatmul.mubr.bf16.vlgmr.msra.gmra.mrb[8].mxu1 %v631_v41 }
 0x28d   :  { %1396 = vmatpush3.bf16.msra.mxu1 %v1566_v40  ;;  %1411 = vmatprep.mubr.msk.bf16.mxu1 %vm1847_vm5, %v1846_v27 }
 0x28e   :  { %1397 = vmatprep.subr.bf16.mxu1 %v1846_v27 }
 0x291   :  { %1398 = vmatpush3.bf16.msra.mxu1 %v1567_v42 }
 0x292   :  { %1399 = vmatprep.subr.bf16.mxu1 %v1846_v27 }
 0x295   :  { %1400 = vmatpush3.bf16.msra.mxu1 %v1568_v43 }
 0x296   :  { %1401 = vmatprep.subr.bf16.mxu1 %v1846_v27 }
 0x299   :  { %1402 = vmatpush3.bf16.msra.mxu1 %v1569_v44 }
 0x29a   :  { %1403 = vmatprep.subr.bf16.mxu1 %v1846_v27 }
 0x29d   :  { %1404 = vmatpush3.bf16.msra.mxu1 %v1570_v45  ;;  %v1328_v45 = vld [vmem:[%s2164_s16] ss:$0 sm:$0xff] }
 0x29e   :  { %1405 = vmatprep.subr.bf16.mxu1 %v1846_v27 }
 0x2a1   :  { %1406 = vmatpush3.bf16.msra.mxu1 %v1571_v46 }
 0x2a2   :  { %1407 = vmatprep.subr.bf16.mxu1 %v1846_v27 }
 0x2a5   :  { %1408 = vmatpush3.bf16.msra.mxu1 %v1572_v47 }
 0x2a6   :  { %1409 = vmatprep.subr.bf16.mxu1 %v1846_v27 }
 0x2a9   :  { %1410 = vmatpush3.bf16.msra.mxu1 %v1573_v48 }
 0x2aa   :  { %1435 = vmatprep.subr.bf16.mxu1 %v1846_v27 }
 0x35f   :  { %v1353_v55 = vpop.f32.mrb[8].mxu1 }
 0x360   :  { %v1354_v57 = vpop.f32.mrb[9].mxu1 }
 0x361   :  { %v1355_v59 = vadd.f32 %v1354_v57, %v1353_v55  ;;  %v1356_v60 = vpop.f32.mrb[10].mxu1 }
 0x362   :  { %v1357_v61 = vpop.f32.mrb[11].mxu1 }
 0x363   :  { %v771_v62 = vadd.f32 %v1355_v59, %v1284_v56 }
 0x365   :  { %v779_v63 = vmax.f32 %v771_v62, 0.0 }
 0x367   :  { %v780_v1 = vsel %vm778_vm6, %v779_v63, %v771_v62 }
 0x368   :  { %v797_v2 = vpack.c.bf16 %v780_v1, %v780_v1 }
 0x36a   :  { %1412 = vmatmul.mubr.bf16.vlgmr.msra.gmra.mrb[12].mxu1 %v797_v2 }
 0x36b   :  { %1451 = vmatprep.mubr.msk.bf16.mxu1 %vm1847_vm5, %v1846_v27  ;;  %1436 = vmatpush3.bf16.msra.mxu1 %v1582_v0 }
 0x36c   :  { %1437 = vmatprep.subr.bf16.mxu1 %v1846_v27 }
 0x36f   :  { %1438 = vmatpush3.bf16.msra.mxu1 %v1583_v5 }
 0x370   :  { %1439 = vmatprep.subr.bf16.mxu1 %v1846_v27 }
 0x373   :  { %1440 = vmatpush3.bf16.msra.mxu1 %v1584_v6 }
 0x374   :  { %1441 = vmatprep.subr.bf16.mxu1 %v1846_v27 }
 0x377   :  { %1442 = vmatpush3.bf16.msra.mxu1 %v1585_v7 }
 0x378   :  { %1443 = vmatprep.subr.bf16.mxu1 %v1846_v27 }
 0x37b   :  { %1444 = vmatpush3.bf16.msra.mxu1 %v1586_v8 }
 0x37c   :  { %1445 = vmatprep.subr.bf16.mxu1 %v1846_v27 }
 0x37f   :  { %1446 = vmatpush3.bf16.msra.mxu1 %v1587_v9 }
 0x380   :  { %1447 = vmatprep.subr.bf16.mxu1 %v1846_v27 }
 0x383   :  { %1448 = vmatpush3.bf16.msra.mxu1 %v1588_v18 }
 0x384   :  { %1449 = vmatprep.subr.bf16.mxu1 %v1846_v27 }
 0x387   :  { %1450 = vmatpush3.bf16.msra.mxu1 %v1589_v19 }
 0x43d   :  { %v887_v11 = vpop.f32.mrb[12].mxu1 }
 0x43e   :  { %v888_v12 = vadd.f32 %v1301_v10, %v887_v11  ;;  %v1413_v13 = vpop.f32.mrb[13].mxu1 }
 0x43f   :  { %v890_v14 = vpop.f32.mrb[14].mxu1 }
 0x440   :  { %v893_v15 = vmax.f32 %v888_v12, 0.0  ;;  %v1414_v16 = vpop.f32.mrb[15].mxu1 }
 0x442   :  { %v910_v17 = vpack.c.bf16 %v893_v15, %v893_v15 }
 0x444   :  { %1432 = vmatmul.mubr.bf16.vlgmr.msra.gmra.mrb[4].mxu0 %v910_v17 }
 0x445   :  { %1471 = vmatprep.mubr.msk.bf16.mxu0 %vm1847_vm5, %v1846_v27  ;;  %1456 = vmatpush3.bf16.msra.mxu0 %v1590_v20 }
 0x446   :  { %1457 = vmatprep.subr.bf16.mxu0 %v1846_v27 }
 0x449   :  { %1458 = vmatpush3.bf16.msra.mxu0 %v1591_v21 }
 0x44a   :  { %1459 = vmatprep.subr.bf16.mxu0 %v1846_v27 }
 0x44d   :  { %1460 = vmatpush3.bf16.msra.mxu0 %v1592_v22 }
 0x44e   :  { %1461 = vmatprep.subr.bf16.mxu0 %v1846_v27 }
 0x451   :  { %1462 = vmatpush3.bf16.msra.mxu0 %v1593_v23 }
 0x452   :  { %1463 = vmatprep.subr.bf16.mxu0 %v1846_v27 }
 0x455   :  { %1464 = vmatpush3.bf16.msra.mxu0 %v1594_v24 }
 0x456   :  { %1465 = vmatprep.subr.bf16.mxu0 %v1846_v27 }
 0x459   :  { %1466 = vmatpush3.bf16.msra.mxu0 %v1595_v25 }
 0x45a   :  { %1467 = vmatprep.subr.bf16.mxu0 %v1846_v27 }
 0x45d   :  { %1468 = vmatpush3.bf16.msra.mxu0 %v1596_v35 }
 0x45e   :  { %1469 = vmatprep.subr.bf16.mxu0 %v1846_v27 }
 0x461   :  { %1470 = vmatpush3.bf16.msra.mxu0 %v1597_v36 }
 0x517   :  { %v1000_v28 = vpop.f32.mrb[4].mxu0 }
 0x518   :  { %v1001_v29 = vadd.f32 %v1310_v26, %v1000_v28  ;;  %v1433_v30 = vpop.f32.mrb[5].mxu0 }
 0x519   :  { %v1003_v31 = vpop.f32.mrb[6].mxu0 }
 0x51a   :  { %v1006_v32 = vmax.f32 %v1001_v29, 0.0  ;;  %v1434_v33 = vpop.f32.mrb[7].mxu0 }
 0x51c   :  { %v1023_v34 = vpack.c.bf16 %v1006_v32, %v1006_v32 }
 0x51e   :  { %1452 = vmatmul.mubr.bf16.vlgmr.msra.gmra.mrb[16].mxu1 %v1023_v34 }
 0x5f1   :  { %v1113_v38 = vpop.f32.mrb[16].mxu1 }
 0x5f2   :  { %v1114_v39 = vadd.f32 %v1319_v37, %v1113_v38  ;;  %v1453_v40 = vpop.f32.mrb[17].mxu1 }
 0x5f3   :  { %v1116_v41 = vpop.f32.mrb[18].mxu1 }
 0x5f4   :  { %v1119_v42 = vmax.f32 %v1114_v39, 0.0  ;;  %v1454_v43 = vpop.f32.mrb[19].mxu1 }
 0x5f6   :  { %v1136_v44 = vpack.c.bf16 %v1119_v42, %v1119_v42 }
 0x5f8   :  { %1472 = vmatmul.mubr.bf16.vlgmr.msra.gmra.mrb[8].mxu0 %v1136_v44 }
 0x6cb   :  { %v1226_v46 = vpop.f32.mrb[8].mxu0 }
 0x6cc   :  { %v1227_v27 = vadd.f32 %v1328_v45, %v1226_v46  ;;  %v1473_v47 = vpop.f32.mrb[9].mxu0 }
 0x6cd   :  { %v1229_v48 = vpop.f32.mrb[10].mxu0 }
 0x6ce   :  { %1233 = vst.msk [vmem:[%s2165_s17] sm:$0xff] %vm1232_vm7, %v1227_v27  ;;  %v1474_v49 = vpop.f32.mrb[11].mxu0 }
 0x6cf   :  { %1238 = vsyncpa [#allocation3], 1 }
 0x6d0   :  { %1239 = vsyncpa [#allocation5], 1 }
 0x6d1   :  { %1240 = vsyncpa [#allocation8], 1 }
 0x6d2   :  { %1241 = vsyncpa [#allocation11], 1 }
 0x6d3   :  { %1242 = vsyncpa [#allocation14], 1 }
 0x6d4   :  { %1243 = vsyncpa [#allocation17], 1 }

</bundles_post_ra>
